<compile_context>
chip_gen: v7x
topology: tpu7x:2x2x1
jax: 0.10.0
libtpu: 0.0.40
codegen_flags: <defaults>
</compile_context>

<pallas_src>
import math

import jax
import jax.numpy as jnp
from jax import lax
from jax.experimental import pallas as pl
from jax.experimental.pallas import tpu as pltpu


def _contract_last(a, b):
    """a: (M, K), b: (N, K) -> (M, N); contracts last dims (MXU-native, no .T)."""
    return lax.dot_general(
        a, b,
        dimension_numbers=(((1,), (1,)), ((), ())),
        preferred_element_type=jnp.float32)


# ----------------------------------------------------------------------------
# Fused kernel: one (row-tile, head) grid point per step.
# ----------------------------------------------------------------------------
def _fused_reprog_kernel(c_ref, tgt_ref, src_ref, val_ref,
                         wq_ref, bq_ref, wk_ref, bk_ref, wv_ref, bv_ref,
                         wo_ref, bo_ref, o_ref, acc_ref):
    h = pl.program_id(1)

    # Per-head Q/K/V projections: y = x @ W_h^T + b_h   (nn.Linear semantics).
    # Fold alpha*beta*scale into Q (smallest tile it can legally live on).
    q = (_contract_last(tgt_ref[...], wq_ref[...]) + bq_ref[...]) * c_ref[0]
    k = _contract_last(src_ref[...], wk_ref[...]) + bk_ref[...]    # (S, E)
    v = _contract_last(val_ref[...], wv_ref[...]) + bv_ref[...]    # (S, E)

    # scores = (alpha*beta/sqrt(E)) * Q @ K^T   (scalar already folded into q)
    scores = _contract_last(q, k)                                  # (tile_m, S)

    # Softmax over S (normalization deferred to the context).
    # TODO(synk): attention dropout (p=0.1) omitted — kernel runs in eval mode.
    m = jnp.max(scores, axis=-1, keepdims=True)
    e = jnp.exp(scores - m)
    denom = jnp.sum(e, axis=-1, keepdims=True)                     # (tile_m, 1)

    ctx = jnp.dot(e, v, preferred_element_type=jnp.float32)        # (tile_m, E)
    ctx = ctx * pl.reciprocal(denom)

    # Output projection, accumulated across heads into resident scratch.
    @pl.when(h == 0)
    def _():
        acc_ref[...] = jnp.zeros_like(acc_ref)

    acc_ref[...] += _contract_last(ctx, wo_ref[...])               # (tile_m, d_llm)

    @pl.when(h == pl.num_programs(1) - 1)
    def _():
        o_ref[...] = (acc_ref[...] + bo_ref[...]).astype(o_ref.dtype)


def _pick_row_tile(n):
    for t in (512, 256, 128, 64, 32, 16, 8):
        if n % t == 0:
            return t
    return n


# ----------------------------------------------------------------------------
# Wrapper: single fused pallas_call over (row tiles, heads)
# ----------------------------------------------------------------------------
def reprogramming_layer_forward(params, target_embedding, source_embedding,
                                value_embedding, n_heads):
    B, L, d_model = target_embedding.shape
    S, d_llm = source_embedding.shape
    H = n_heads
    HE = params["wq"].shape[0]
    E = HE // H
    BL = B * L
    tile_m = _pick_row_tile(BL)
    n_row_tiles = BL // tile_m
    scale = 1.0 / math.sqrt(E)

    # Weight / bias layout plumbing (tiny tensors, one-time relayout).
    tgt2d = target_embedding.reshape(BL, d_model)
    wq = params["wq"].reshape(H, E, d_model)
    bq = params["bq"].reshape(H, 1, E)
    wk = params["wk"].reshape(H, E, d_llm)
    bk = params["bk"].reshape(H, 1, E)
    wv = params["wv"].reshape(H, E, d_llm)
    bv = params["bv"].reshape(H, 1, E)
    wo = jnp.transpose(params["wo"].reshape(d_llm, H, E), (1, 0, 2))   # (H, d_llm, E)
    bo = params["bo"].reshape(1, d_llm)
    c = (jnp.asarray(params["alpha"], jnp.float32)
         * jnp.asarray(params["beta"], jnp.float32)
         * jnp.float32(scale)).reshape(1)                              # folded scalar

    out = pl.pallas_call(
        _fused_reprog_kernel,
        out_shape=jax.ShapeDtypeStruct((BL, d_llm), jnp.float32),
        grid=(n_row_tiles, H),
        in_specs=[
            pl.BlockSpec(memory_space=pltpu.MemorySpace.SMEM),          # folded scalar
            pl.BlockSpec((tile_m, d_model), lambda i, h: (i, 0)),       # target rows
            pl.BlockSpec((S, d_llm), lambda i, h: (0, 0)),              # source (resident)
            pl.BlockSpec((S, d_llm), lambda i, h: (0, 0)),              # value  (resident)
            pl.BlockSpec((None, E, d_model), lambda i, h: (h, 0, 0)),   # wq head slab
            pl.BlockSpec((None, 1, E), lambda i, h: (h, 0, 0)),         # bq head slab
            pl.BlockSpec((None, E, d_llm), lambda i, h: (h, 0, 0)),     # wk head slab
            pl.BlockSpec((None, 1, E), lambda i, h: (h, 0, 0)),         # bk head slab
            pl.BlockSpec((None, E, d_llm), lambda i, h: (h, 0, 0)),     # wv head slab
            pl.BlockSpec((None, 1, E), lambda i, h: (h, 0, 0)),         # bv head slab
            pl.BlockSpec((None, d_llm, E), lambda i, h: (h, 0, 0)),     # wo head slab
            pl.BlockSpec((1, d_llm), lambda i, h: (0, 0)),              # bo
        ],
        out_specs=pl.BlockSpec((tile_m, d_llm), lambda i, h: (i, 0)),
        scratch_shapes=[pltpu.VMEM((tile_m, d_llm), jnp.float32)],
        compiler_params=pltpu.CompilerParams(
            dimension_semantics=("parallel", "arbitrary")),
    )(c, tgt2d, source_embedding, value_embedding,
      wq, bq, wk, bk, wv, bv, wo, bo)

    return out.reshape(B, L, d_llm)


# ----------------------------------------------------------------------------
# Pure-JAX reference (mirrors the PyTorch forward exactly, eval mode)
# ----------------------------------------------------------------------------
def reference_forward(params, target_embedding, source_embedding,
                      value_embedding, n_heads):
    B, L, d_model = target_embedding.shape
    S, d_llm = source_embedding.shape
    H = n_heads

    def lin(x, w, b):
        return x @ w.T + b

    q = lin(target_embedding, params["wq"], params["bq"]).reshape(B, L, H, -1)
    k = lin(source_embedding, params["wk"], params["bk"]).reshape(S, H, -1)
    v = lin(value_embedding, params["wv"], params["bv"]).reshape(S, H, -1)
    E = q.shape[-1]
    scale = 1.0 / math.sqrt(E)
    scores = jnp.einsum("blhe,she->bhls", params["alpha"] * q, params["beta"] * k)
    A = jax.nn.softmax(scale * scores, axis=-1)
    out = jnp.einsum("bhls,she->blhe", A, v).reshape(B, L, -1)
    return lin(out, params["wo"], params["bo"])


if __name__ == "__main__":
    B, L, S = 2, 8, 16
    d_model, n_heads, d_llm = 32, 4, 64
    d_keys = d_model // n_heads  # 8

    key = jax.random.PRNGKey(0)
    keys = jax.random.split(key, 11)

    def linear_init(kw, kb, out_dim, in_dim):
        bound = 1.0 / math.sqrt(in_dim)
        w = jax.random.uniform(kw, (out_dim, in_dim), jnp.float32, -bound, bound)
        b = jax.random.uniform(kb, (out_dim,), jnp.float32, -bound, bound)
        return w, b

    wq, bq = linear_init(keys[0], keys[1], d_keys * n_heads, d_model)
    wk, bk = linear_init(keys[2], keys[3], d_keys * n_heads, d_llm)
    wv, bv = linear_init(keys[4], keys[5], d_keys * n_heads, d_llm)
    wo, bo = linear_init(keys[6], keys[7], d_llm, d_keys * n_heads)

    target = jax.random.normal(keys[8], (B, L, d_model), jnp.float32)
    source = jax.random.normal(keys[9], (S, d_llm), jnp.float32)
    value = jax.random.normal(keys[10], (S, d_llm), jnp.float32)

    base = dict(wq=wq, bq=bq, wk=wk, bk=bk, wv=wv, bv=bv, wo=wo, bo=bo)
    # NOTE: self.adapter / self.norm_layer exist in __init__ but are unused in
    # forward, so they are intentionally not instantiated here.

    # Case 1: module init values (alpha=1, beta=0).
    # Case 2: nonzero beta so the softmax path sees real dynamic range.
    for alpha, beta in ((1.0, 0.0), (1.2, 0.7)):
        params = dict(base, alpha=jnp.float32(alpha), beta=jnp.float32(beta))
        out = reprogramming_layer_forward(params, target, source, value, n_heads)
        out = jax.block_until_ready(out)
        ref = reference_forward(params, target, source, value, n_heads)
        assert out.shape == (B, L, d_llm), out.shape
        assert jnp.allclose(out, ref, atol=1e-4, rtol=1e-4), (
            f"mismatch vs reference (alpha={alpha}, beta={beta})")

    print("KERNEL_OK")
</pallas_src>

<mosaic_0001>
module attributes {stable_mosaic.version = 11 : i64} {
  func.func @_fused_reprog_kernel(%arg0: i32, %arg1: i32, %arg2: memref<1xf32, #tpu.memory_space<smem>>, %arg3: memref<16x32xf32, #tpu.memory_space<vmem>>, %arg4: memref<16x64xf32, #tpu.memory_space<vmem>>, %arg5: memref<16x64xf32, #tpu.memory_space<vmem>>, %arg6: memref<1x8x32xf32, #tpu.memory_space<vmem>>, %arg7: memref<1x1x8xf32, #tpu.memory_space<vmem>>, %arg8: memref<1x8x64xf32, #tpu.memory_space<vmem>>, %arg9: memref<1x1x8xf32, #tpu.memory_space<vmem>>, %arg10: memref<1x8x64xf32, #tpu.memory_space<vmem>>, %arg11: memref<1x1x8xf32, #tpu.memory_space<vmem>>, %arg12: memref<1x64x8xf32, #tpu.memory_space<vmem>>, %arg13: memref<1x64xf32, #tpu.memory_space<vmem>>, %arg14: memref<16x64xf32, #tpu.memory_space<vmem>>, %arg15: memref<16x64xf32, #tpu.memory_space<vmem>>) attributes {dimension_semantics = [#tpu.dimension_semantics<parallel>, #tpu.dimension_semantics<arbitrary>], iteration_bounds = array<i64: 1, 4>, scalar_prefetch = 0 : i64, scratch_operands = 1 : i64, tpu.core_type = #tpu.core_type<tc>, window_params = [{transform_indices = @transform_0, window_bounds = array<i64: 1>}, {transform_indices = @transform_1, window_bounds = array<i64: 16, 32>}, {pipeline_mode = #tpu.pipeline_mode<synchronous>, transform_indices = @transform_2, window_bounds = array<i64: 16, 64>}, {pipeline_mode = #tpu.pipeline_mode<synchronous>, transform_indices = @transform_3, window_bounds = array<i64: 16, 64>}, {transform_indices = @transform_4, window_bounds = array<i64: 1, 8, 32>}, {transform_indices = @transform_5, window_bounds = array<i64: 1, 1, 8>}, {transform_indices = @transform_6, window_bounds = array<i64: 1, 8, 64>}, {transform_indices = @transform_7, window_bounds = array<i64: 1, 1, 8>}, {transform_indices = @transform_8, window_bounds = array<i64: 1, 8, 64>}, {transform_indices = @transform_9, window_bounds = array<i64: 1, 1, 8>}, {transform_indices = @transform_10, window_bounds = array<i64: 1, 64, 8>}, {pipeline_mode = #tpu.pipeline_mode<synchronous>, transform_indices = @transform_11, window_bounds = array<i64: 1, 64>}, {transform_indices = @transform_12, window_bounds = array<i64: 16, 64>}]} {
    %c0 = arith.constant 0 : index
    %c0_0 = arith.constant 0 : index
    %0 = vector.load %arg3[%c0, %c0_0] : memref<16x32xf32, #tpu.memory_space<vmem>>, vector<16x32xf32>
    %c0_1 = arith.constant 0 : index
    %c0_2 = arith.constant 0 : index
    %c0_3 = arith.constant 0 : index
    %1 = vector.load %arg6[%c0_1, %c0_2, %c0_3] : memref<1x8x32xf32, #tpu.memory_space<vmem>>, vector<1x8x32xf32>
    %2 = vector.shape_cast %1 : vector<1x8x32xf32> to vector<8x32xf32>
    %cst = arith.constant dense<0.000000e+00> : vector<16x8xf32>
    %3 = tpu.matmul %0, %2, %cst {dimension_numbers = #tpu.dot_dimension_numbers<[1], [1], [0], [0], [0, 0, 1, 0], [], []>} : vector<16x32xf32>, vector<8x32xf32>, vector<16x8xf32> -> vector<16x8xf32>
    %c0_4 = arith.constant 0 : index
    %c0_5 = arith.constant 0 : index
    %c0_6 = arith.constant 0 : index
    %4 = vector.load %arg7[%c0_4, %c0_5, %c0_6] : memref<1x1x8xf32, #tpu.memory_space<vmem>>, vector<1x1x8xf32>
    %5 = vector.shape_cast %4 : vector<1x1x8xf32> to vector<1x8xf32>
    %6 = vector.broadcast %5 : vector<1x8xf32> to vector<16x8xf32>
    %7 = arith.addf %3, %6 : vector<16x8xf32>
    %c0_7 = arith.constant 0 : index
    %8 = memref.load %arg2[%c0_7] : memref<1xf32, #tpu.memory_space<smem>>
    %9 = vector.broadcast %8 : f32 to vector<16x8xf32>
    %10 = arith.mulf %7, %9 : vector<16x8xf32>
    %c0_8 = arith.constant 0 : index
    %c0_9 = arith.constant 0 : index
    %11 = vector.load %arg4[%c0_8, %c0_9] : memref<16x64xf32, #tpu.memory_space<vmem>>, vector<16x64xf32>
    %c0_10 = arith.constant 0 : index
    %c0_11 = arith.constant 0 : index
    %c0_12 = arith.constant 0 : index
    %12 = vector.load %arg8[%c0_10, %c0_11, %c0_12] : memref<1x8x64xf32, #tpu.memory_space<vmem>>, vector<1x8x64xf32>
    %13 = vector.shape_cast %12 : vector<1x8x64xf32> to vector<8x64xf32>
    %cst_13 = arith.constant dense<0.000000e+00> : vector<16x8xf32>
    %14 = tpu.matmul %11, %13, %cst_13 {dimension_numbers = #tpu.dot_dimension_numbers<[1], [1], [0], [0], [0, 0, 1, 0], [], []>} : vector<16x64xf32>, vector<8x64xf32>, vector<16x8xf32> -> vector<16x8xf32>
    %c0_14 = arith.constant 0 : index
    %c0_15 = arith.constant 0 : index
    %c0_16 = arith.constant 0 : index
    %15 = vector.load %arg9[%c0_14, %c0_15, %c0_16] : memref<1x1x8xf32, #tpu.memory_space<vmem>>, vector<1x1x8xf32>
    %16 = vector.shape_cast %15 : vector<1x1x8xf32> to vector<1x8xf32>
    %17 = vector.broadcast %16 : vector<1x8xf32> to vector<16x8xf32>
    %18 = arith.addf %14, %17 : vector<16x8xf32>
    %c0_17 = arith.constant 0 : index
    %c0_18 = arith.constant 0 : index
    %19 = vector.load %arg5[%c0_17, %c0_18] : memref<16x64xf32, #tpu.memory_space<vmem>>, vector<16x64xf32>
    %c0_19 = arith.constant 0 : index
    %c0_20 = arith.constant 0 : index
    %c0_21 = arith.constant 0 : index
    %20 = vector.load %arg10[%c0_19, %c0_20, %c0_21] : memref<1x8x64xf32, #tpu.memory_space<vmem>>, vector<1x8x64xf32>
    %21 = vector.shape_cast %20 : vector<1x8x64xf32> to vector<8x64xf32>
    %cst_22 = arith.constant dense<0.000000e+00> : vector<16x8xf32>
    %22 = tpu.matmul %19, %21, %cst_22 {dimension_numbers = #tpu.dot_dimension_numbers<[1], [1], [0], [0], [0, 0, 1, 0], [], []>} : vector<16x64xf32>, vector<8x64xf32>, vector<16x8xf32> -> vector<16x8xf32>
    %c0_23 = arith.constant 0 : index
    %c0_24 = arith.constant 0 : index
    %c0_25 = arith.constant 0 : index
    %23 = vector.load %arg11[%c0_23, %c0_24, %c0_25] : memref<1x1x8xf32, #tpu.memory_space<vmem>>, vector<1x1x8xf32>
    %24 = vector.shape_cast %23 : vector<1x1x8xf32> to vector<1x8xf32>
    %25 = vector.broadcast %24 : vector<1x8xf32> to vector<16x8xf32>
    %26 = arith.addf %22, %25 : vector<16x8xf32>
    %cst_26 = arith.constant dense<0.000000e+00> : vector<16x16xf32>
    %27 = tpu.matmul %10, %18, %cst_26 {dimension_numbers = #tpu.dot_dimension_numbers<[1], [1], [0], [0], [0, 0, 1, 0], [], []>} : vector<16x8xf32>, vector<16x8xf32>, vector<16x16xf32> -> vector<16x16xf32>
    %cst_27 = arith.constant dense<0xFF800000> : vector<16xf32>
    %28 = vector.multi_reduction <maximumf>, %27, %cst_27 [1] : vector<16x16xf32> to vector<16xf32>
    %29 = vector.shape_cast %28 : vector<16xf32> to vector<16x1xf32>
    %30 = vector.broadcast %29 : vector<16x1xf32> to vector<16x16xf32>
    %31 = arith.subf %27, %30 : vector<16x16xf32>
    %32 = math.exp %31 : vector<16x16xf32>
    %cst_28 = arith.constant dense<0.000000e+00> : vector<16xf32>
    %33 = vector.multi_reduction <add>, %32, %cst_28 [1] : vector<16x16xf32> to vector<16xf32>
    %34 = vector.shape_cast %33 : vector<16xf32> to vector<16x1xf32>
    %cst_29 = arith.constant dense<0.000000e+00> : vector<16x8xf32>
    %35 = tpu.matmul %32, %26, %cst_29 {dimension_numbers = #tpu.dot_dimension_numbers<[1], [0], [0], [1], [0, 0, 1, 1], [], []>} : vector<16x16xf32>, vector<16x8xf32>, vector<16x8xf32> -> vector<16x8xf32>
    %36 = tpu.reciprocal %34 : vector<16x1xf32> -> vector<16x1xf32>
    %37 = vector.broadcast %36 : vector<16x1xf32> to vector<16x8xf32>
    %38 = arith.mulf %35, %37 : vector<16x8xf32>
    %c0_i32 = arith.constant 0 : i32
    %39 = arith.cmpi eq, %arg1, %c0_i32 : i32
    %40 = arith.extui %39 : i1 to i32
    %c0_i32_30 = arith.constant 0 : i32
    %41 = arith.cmpi ne, %40, %c0_i32_30 : i32
    scf.if %41 {
      %cst_40 = arith.constant 0.000000e+00 : f32
      %51 = vector.broadcast %cst_40 : f32 to vector<16x64xf32>
      %c0_41 = arith.constant 0 : index
      %c0_42 = arith.constant 0 : index
      %52 = vector.load %arg15[%c0_41, %c0_42] : memref<16x64xf32, #tpu.memory_space<vmem>>, vector<16x64xf32>
      tpu.vector_store %arg15[%c0_41, %c0_42], %51 {strides = array<i32>} : memref<16x64xf32, #tpu.memory_space<vmem>>, vector<16x64xf32>,
    } else {
    }
    %c0_31 = arith.constant 0 : index
    %c0_32 = arith.constant 0 : index
    %42 = vector.load %arg15[%c0_31, %c0_32] : memref<16x64xf32, #tpu.memory_space<vmem>>, vector<16x64xf32>
    %c0_33 = arith.constant 0 : index
    %c0_34 = arith.constant 0 : index
    %c0_35 = arith.constant 0 : index
    %43 = vector.load %arg12[%c0_33, %c0_34, %c0_35] : memref<1x64x8xf32, #tpu.memory_space<vmem>>, vector<1x64x8xf32>
    %44 = vector.shape_cast %43 : vector<1x64x8xf32> to vector<64x8xf32>
    %cst_36 = arith.constant dense<0.000000e+00> : vector<16x64xf32>
    %45 = tpu.matmul %38, %44, %cst_36 {dimension_numbers = #tpu.dot_dimension_numbers<[1], [1], [0], [0], [0, 0, 1, 0], [], []>} : vector<16x8xf32>, vector<64x8xf32>, vector<16x64xf32> -> vector<16x64xf32>
    %46 = arith.addf %42, %45 : vector<16x64xf32>
    %c0_37 = arith.constant 0 : index
    %c0_38 = arith.constant 0 : index
    %47 = vector.load %arg15[%c0_37, %c0_38] : memref<16x64xf32, #tpu.memory_space<vmem>>, vector<16x64xf32>
    tpu.vector_store %arg15[%c0_37, %c0_38], %46 {strides = array<i32>} : memref<16x64xf32, #tpu.memory_space<vmem>>, vector<16x64xf32>,
    %c3_i32 = arith.constant 3 : i32
    %48 = arith.cmpi eq, %arg1, %c3_i32 : i32
    %49 = arith.extui %48 : i1 to i32
    %c0_i32_39 = arith.constant 0 : i32
    %50 = arith.cmpi ne, %49, %c0_i32_39 : i32
    scf.if %50 {
      %c0_40 = arith.constant 0 : index
      %c0_41 = arith.constant 0 : index
      %51 = vector.load %arg15[%c0_40, %c0_41] : memref<16x64xf32, #tpu.memory_space<vmem>>, vector<16x64xf32>
      %c0_42 = arith.constant 0 : index
      %c0_43 = arith.constant 0 : index
      %52 = vector.load %arg13[%c0_42, %c0_43] : memref<1x64xf32, #tpu.memory_space<vmem>>, vector<1x64xf32>
      %53 = vector.broadcast %52 : vector<1x64xf32> to vector<16x64xf32>
      %54 = arith.addf %51, %53 : vector<16x64xf32>
      %c0_44 = arith.constant 0 : index
      %c0_45 = arith.constant 0 : index
      %55 = vector.load %arg14[%c0_44, %c0_45] : memref<16x64xf32, #tpu.memory_space<vmem>>, vector<16x64xf32>
      tpu.vector_store %arg14[%c0_44, %c0_45], %54 {strides = array<i32>} : memref<16x64xf32, #tpu.memory_space<vmem>>, vector<16x64xf32>,
    } else {
    }
    return
  }
  func.func @transform_0(%arg0: i32, %arg1: i32) -> i32 {
    %c0_i32 = arith.constant 0 : i32
    %c0_i32_0 = arith.constant 0 : i32
    return %c0_i32 : i32
  }
  func.func @transform_1(%arg0: i32, %arg1: i32) -> (i32, i32) {
    %c0_i32 = arith.constant 0 : i32
    %c0_i32_0 = arith.constant 0 : i32
    return %arg0, %c0_i32 : i32, i32
  }
  func.func @transform_2(%arg0: i32, %arg1: i32) -> (i32, i32) {
    %c0_i32 = arith.constant 0 : i32
    %c0_i32_0 = arith.constant 0 : i32
    %c0_i32_1 = arith.constant 0 : i32
    return %c0_i32, %c0_i32_0 : i32, i32
  }
  func.func @transform_3(%arg0: i32, %arg1: i32) -> (i32, i32) {
    %c0_i32 = arith.constant 0 : i32
    %c0_i32_0 = arith.constant 0 : i32
    %c0_i32_1 = arith.constant 0 : i32
    return %c0_i32, %c0_i32_0 : i32, i32
  }
  func.func @transform_4(%arg0: i32, %arg1: i32) -> (i32, i32, i32) {
    %c0_i32 = arith.constant 0 : i32
    %c0_i32_0 = arith.constant 0 : i32
    %c0_i32_1 = arith.constant 0 : i32
    return %arg1, %c0_i32, %c0_i32_0 : i32, i32, i32
  }
  func.func @transform_5(%arg0: i32, %arg1: i32) -> (i32, i32, i32) {
    %c0_i32 = arith.constant 0 : i32
    %c0_i32_0 = arith.constant 0 : i32
    %c0_i32_1 = arith.constant 0 : i32
    return %arg1, %c0_i32, %c0_i32_0 : i32, i32, i32
  }
  func.func @transform_6(%arg0: i32, %arg1: i32) -> (i32, i32, i32) {
    %c0_i32 = arith.constant 0 : i32
    %c0_i32_0 = arith.constant 0 : i32
    %c0_i32_1 = arith.constant 0 : i32
    return %arg1, %c0_i32, %c0_i32_0 : i32, i32, i32
  }
  func.func @transform_7(%arg0: i32, %arg1: i32) -> (i32, i32, i32) {
    %c0_i32 = arith.constant 0 : i32
    %c0_i32_0 = arith.constant 0 : i32
    %c0_i32_1 = arith.constant 0 : i32
    return %arg1, %c0_i32, %c0_i32_0 : i32, i32, i32
  }
  func.func @transform_8(%arg0: i32, %arg1: i32) -> (i32, i32, i32) {
    %c0_i32 = arith.constant 0 : i32
    %c0_i32_0 = arith.constant 0 : i32
    %c0_i32_1 = arith.constant 0 : i32
    return %arg1, %c0_i32, %c0_i32_0 : i32, i32, i32
  }
  func.func @transform_9(%arg0: i32, %arg1: i32) -> (i32, i32, i32) {
    %c0_i32 = arith.constant 0 : i32
    %c0_i32_0 = arith.constant 0 : i32
    %c0_i32_1 = arith.constant 0 : i32
    return %arg1, %c0_i32, %c0_i32_0 : i32, i32, i32
  }
  func.func @transform_10(%arg0: i32, %arg1: i32) -> (i32, i32, i32) {
    %c0_i32 = arith.constant 0 : i32
    %c0_i32_0 = arith.constant 0 : i32
    %c0_i32_1 = arith.constant 0 : i32
    return %arg1, %c0_i32, %c0_i32_0 : i32, i32, i32
  }
  func.func @transform_11(%arg0: i32, %arg1: i32) -> (i32, i32) {
    %c0_i32 = arith.constant 0 : i32
    %c0_i32_0 = arith.constant 0 : i32
    %c0_i32_1 = arith.constant 0 : i32
    return %c0_i32, %c0_i32_0 : i32, i32
  }
  func.func @transform_12(%arg0: i32, %arg1: i32) -> (i32, i32) {
    %c0_i32 = arith.constant 0 : i32
    %c0_i32_0 = arith.constant 0 : i32
    return %arg0, %c0_i32 : i32, i32
  }
}

</mosaic_0001>

<bundles_post_ra>
// kernel: tpu_custom_call.1
= control target key start
LH: loop header
LB: loop body
LE: loop exit
PB: predicated region body
PF: predicated region fallthrough
CT: control target
= control target key end

     0   :  { %s1794_s0 = inlined_call_operand.<no memory space> [shape: f32[1], index: 0, kind: input, shape index: {}]   ;;  %s1795_s1 = inlined_call_operand.vmem [shape: f32[16,32], index: 1, kind: input, shape index: {}]   ;;  %s1796_s2 = inlined_call_operand.vmem [shape: f32[16,64], index: 2, kind: input, shape index: {}]   ;;  %s1797_s3 = inlined_call_operand.vmem [shape: f32[16,64], index: 3, kind: input, shape index: {}]   ;;  %s1798_s4 = inlined_call_operand.vmem [shape: f32[4,8,32], index: 4, kind: input, shape index: {}]   ;;  %s1799_s5 = inlined_call_operand.vmem [shape: f32[4,1,8], index: 5, kind: input, shape index: {}]   ;;  %s1800_s6 = inlined_call_operand.vmem [shape: f32[4,8,64], index: 6, kind: input, shape index: {}]   ;;  %s1801_s7 = inlined_call_operand.vmem [shape: f32[4,1,8], index: 7, kind: input, shape index: {}]   ;;  %s1802_s8 = inlined_call_operand.vmem [shape: f32[4,8,64], index: 8, kind: input, shape index: {}]   ;;  %s1803_s9 = inlined_call_operand.vmem [shape: f32[4,1,8], index: 9, kind: input, shape index: {}]   ;;  %s1804_s10 = inlined_call_operand.vmem [shape: f32[4,64,8], index: 10, kind: input, shape index: {}]   ;;  %s1805_s11 = inlined_call_operand.vmem [shape: f32[1,64], index: 11, kind: input, shape index: {}]   ;;  %s1806_s12 = inlined_call_operand.hbm [shape: f32[16,64], index: 12, kind: output, shape index: {}]  }
   0x1   :  { %17 = sst [smem:[#allocation3]] %s1794_s0 }
   0x2   :  { %18 = vsyncpa [#allocation5], 0  ;;  %s1619_s23 = smov 0   ;;  %s1621_s24 = smov 0  }
   0x3   :  { %s1623_s25 = smov 0  }
   0x4 LB: > { %s1296_s0 = sadd.s32 4294967295, %s1545_s25   ;;  %s33_s26 = sadd.s32 1, %s1541_s24  ;;  %s1545_s25 = sphi %s1623_s25, %s24_s25   ;;  %s1541_s24 = sphi %s1621_s24, %s1811_s24   ;;  %s1537_s23 = sphi %s1619_s23, %s1810_s23  }
   0x5   : > { %p34_p0 = scmp.ge.s32.totalorder %s33_s26, 4  ;;  %p1300_p1 = scmp.ge.s32.totalorder %s1545_s25, 1 }
   0x6   : > { %p438_p2 = scmp.lt.s32.totalorder %s1545_s25, 5 }
   0x7   : > { %s1813_s26 = smov (%p34_p0, %s33_s26), 0 }
   0x8   : > { %p439_p3 = pnand %p1300_p1, %p438_p2 }
   0x9   : > { %p507_p4 = scmp.lt.s32.totalorder (!%p439_p3), %s1537_s23, 3  ;;  %vm544_vm0 = vcmask (!%p439_p3), 261120   ;;  %v534_v0 = vld [vmem:[%s1795_s1] sm:$0xff] (!%p439_p3)  ;;  %vm643_vm1 = vcmask (!%p439_p3), 523264   ;;  %v535_v3 = vld [vmem:[%s1795_s1 + $0x8] sm:$0xff] (!%p439_p3)  ;;  %s629_s14 = sld [smem:[#allocation3]] (!%p439_p3) }
   0xa   : > { %442 = sbr.rel (%p439_p3) target bundleno = 1131 (0x46b), region = 68  ;;  %1371 = vmatprep.mubr.msk.f32.mxu1 (!%p439_p3), %vm544_vm0, %v534_v0  ;;  %v633_v4 = vld [vmem:[%s1796_s2] sm:$0xff] (!%p439_p3)  ;;  %v634_v5 = vld [vmem:[%s1796_s2 + $0x8] sm:$0xff] (!%p439_p3)  ;;  %vm822_vm2 = vcmask (!%p439_p3), 64512   ;;  %vm910_vm4 = vcmask (!%p439_p3), 130048   ;;  %p1324_p5 = scmp.ne.s32.totalorder (!%p439_p3), %s1537_s23, 0 }
   0xb   : > { %v728_v7 = vld [vmem:[%s1797_s3] sm:$0xff] (!%p439_p3)  ;;  %v729_v8 = vld [vmem:[%s1797_s3 + $0x8] sm:$0xff] (!%p439_p3)  ;;  %vm1701_vm3 = vmpackc.low (!%p439_p3), %vm822_vm2, %vm822_vm2 }
   0xf   : > { %v630_v11 = vstv (!%p439_p3), %s629_s14 }
  0x11   : > { %s1646_s29 = scalar_select %p507_p4, %s1537_s23, 3 }
  0x12   : > { %v1547_v52 = vmov (!%p1324_p5), 0.0  }
  0x13   : > { %s1301_s30 = sshll.u32 %s1646_s29, 3  ;;  %s1341_s13 = sshll.u32 %s1646_s29, 6  ;;  %1018 = vst.msk [vmem:[#allocation2] sm:$0xff] (!%p1324_p5), %vm643_vm1, %v1547_v52  ;;  %1019 = vst.msk [vmem:[#allocation2 + $0x8] sm:$0xff] (!%p1324_p5), %vm643_vm1, %v1547_v52 }
  0x14   : > { %s510_s16 = scalar_lea.vmem %s1798_s4, %s1301_s30  ;;  %s1656_s19 = scalar_lea.vmem %s1804_s10, %s1341_s13 }
  0x15   : > { %v536_v1 = vld [vmem:[%s510_s16] sm:$0xff]  ;;  %s517_s22 = scalar_lea.vmem %s1800_s6, %s1301_s30  ;;  %s524_s20 = scalar_lea.vmem %s1802_s8, %s1301_s30 }
  0x16   : > { %1369 = vmatprep.subr.msk.mxu1 %vm544_vm0, %v536_v1  ;;  %v635_v2 = vld [vmem:[%s517_s22] sm:$0xff]  ;;  %s513_s15 = scalar_lea.vmem %s1799_s5, %s1646_s29  ;;  %s520_s18 = scalar_lea.vmem %s1801_s7, %s1646_s29 }
  0x17   : > { %1370 = vmatpush3.xpose.msk.msra.mxu1 %vm544_vm0, %v536_v1  ;;  %v730_v6 = vld [vmem:[%s524_s20] sm:$0xff]  ;;  %s527_s22 = scalar_lea.vmem %s1803_s9, %s1646_s29 }
  0x18   : > { %1374 = vmatprep.subr.msk.mxu1 %vm643_vm1, %v635_v2  ;;  %v1306_v9 = vld [vmem:[%s513_s15] ss:$0 sm:$0xff] }
  0x19   : > { %v1310_v14 = vld [vmem:[%s520_s18] ss:$0 sm:$0xff] }
  0x1a   : > { %1372 = vmatmul.mubr.msk.f32.vlgmr.msra.gmra.mrb[0].mxu1 %vm544_vm0, %v535_v3  ;;  %v1314_v24 = vld [vmem:[%s527_s22] ss:$0 sm:$0xff] }
  0x1b   : > { %1375 = vmatpush3.xpose.msk.msra.mxu1 %vm643_vm1, %v635_v2  ;;  %1376 = vmatprep.mubr.msk.f32.mxu1 %vm643_vm1, %v633_v4 }
  0x1c   : > { %1379 = vmatprep.subr.msk.mxu1 %vm643_vm1, %v730_v6 }
  0x1e   : > { %1377 = vmatmul.mubr.msk.f32.vlgmr.msra.gmra.mrb[2].mxu1 %vm643_vm1, %v634_v5 }
  0x1f   : > { %1380 = vmatpush3.xpose.msk.msra.mxu1 %vm643_vm1, %v730_v6  ;;  %1381 = vmatprep.mubr.msk.f32.mxu1 %vm643_vm1, %v728_v7 }
  0x22   : > { %1382 = vmatmul.mubr.msk.f32.vlgmr.msra.gmra.mrb[4].mxu1 %vm643_vm1, %v729_v8 }
  0xed   : > { %v1373_v10 = vpop.f32.mrb[0].mxu1 }
  0xee   : > { %v620_v12 = vpop.f32.mrb[1].mxu1  ;;  %v626_v22 = vadd.f32 %v1373_v10, %v1306_v9 }
  0xef   : > { %v621_v13 = vadd.f32 %v1306_v9, %v620_v12 }
  0xf0   : > { %v632_v23 = vmul.f32 %v630_v11, %v626_v22 }
  0xf1   : > { %v631_v15 = vmul.f32 %v630_v11, %v621_v13  ;;  %v1378_v16 = vpop.f32.mrb[2].mxu1 }
  0xf2   : > { %v725_v17 = vadd.f32 %v1378_v16, %v1310_v14  ;;  %v719_v18 = vpop.f32.mrb[3].mxu1 }
  0xf3   : > { %v720_v19 = vadd.f32 %v1310_v14, %v719_v18  ;;  %1388 = vmatprep.mubr.msk.f32.mxu1 %vm822_vm2, %v631_v15 }
  0xf5   : > { %v1417_v21 = vpack.c.bf16 %v725_v17, %v720_v19  ;;  %v1383_v25 = vpop.f32.mrb[4].mxu1 }
  0xf6   : > { %v819_v26 = vadd.f32 %v1383_v25, %v1314_v24  ;;  %v813_v27 = vpop.f32.mrb[5].mxu1 }
  0xf7   : > { %1419 = vmatprep.subr.msk.bf16.mxu1 %vm1701_vm3, %v1417_v21  ;;  %v814_v28 = vadd.f32 %v1314_v24, %v813_v27 }
  0xf8   : > { %1422 = vmatpush3.bf16.xpose.msk.msra.mxu1 %vm1701_vm3, %v1417_v21 }
  0xf9   : > { %v1423_v29 = vpack.c.bf16 %v819_v26, %v814_v28 }
  0xfb   : > { %1424 = vmatprep.subr.bf16.mxu1 %v1423_v29 }
  0xff   : > { %1389 = vmatmul.mubr.msk.f32.vlgmr.msra.gmra.mrb[6].mxu1 %vm822_vm2, %v632_v23 }
 0x100   : > { %1426 = vmatpush3.bf16.msra.mxu1 %v1423_v29 }
 0x1d2   : > { %v1390_v30 = vpop.f32.mrb[6].mxu1 }
 0x1d3   : > { %v901_v31 = vpop.f32.mrb[7].mxu1  ;;  %v914_v33 = vsel %vm910_vm4, %v1390_v30, -inf }
 0x1d4   : > { %v911_v32 = vsel %vm910_vm4, %v901_v31, -inf }
 0x1d5   : > { %912 = vmax.xlane.f32.xlu0 %v911_v32 }
 0x1d9   : > { %915 = vmax.xlane.f32.xlu0 %v914_v33 }
 0x262   : > { %v913_v34 = vpop.xlane.xlu0 %912 }
 0x263   : > { %v917_v35 = vsub.f32 %v901_v31, %v913_v34 }
 0x265   : > { %v919_v36 = vmul.f32 1.442695, %v917_v35 }
 0x266   : > { %v916_v37 = vpop.xlane.xlu0 %915 }
 0x267   : > { %1485 = vpow2.f32 %v919_v36  ;;  %v918_v38 = vsub.f32 %v1390_v30, %v916_v37 }
 0x269   : > { %v921_v39 = vmul.f32 1.442695, %v918_v38 }
 0x26b   : > { %1487 = vpow2.f32 %v921_v39 }
 0x271   : > { %v1486_v40 = vpop.eup %1485 }
 0x272   : > { %1395 = vmatprep.mubr.msk.f32.mxu1 %vm910_vm4, %v1486_v40  ;;  %v923_v41 = vsel %vm910_vm4, %v1486_v40, 0.0 }
 0x273   : > { %924 = vadd.xlane.f32.xlu1 %v923_v41 }
 0x275   : > { %v1488_v42 = vpop.eup %1487 }
 0x276   : > { %1396 = vmatmul.mubr.msk.f32.vlgmr.msra.gmra.mrb[8].mxu1 %vm910_vm4, %v1488_v42  ;;  %v926_v43 = vsel %vm910_vm4, %v1488_v42, 0.0 }
 0x277   : > { %927 = vadd.xlane.f32.xlu1 %v926_v43 }
 0x300   : > { %v925_v44 = vpop.xlane.xlu1 %924 }
 0x304   : > { %v928_v45 = vpop.xlane.xlu1 %927 }
 0x305   : > { %1489 = vrcp.f32 %v928_v45 }
 0x306   : > { %1491 = vrcp.f32 %v925_v44 }
 0x30f   : > { %v1490_v46 = vpop.eup %1489 }
 0x310   : > { %v1492_v48 = vpop.eup %1491 }
 0x345   : > { %1017 = sbr.rel (%p1324_p5) target bundleno = 844 (0x34c), region = 72 }
 0x349   : > { %v1397_v47 = vpop.f32.mrb[8].mxu1 }
 0x34a   : > { %v1013_v49 = vmul.f32 %v1490_v46, %v1397_v47  ;;  %v1001_v50 = vpop.f32.mrb[9].mxu1 }
 0x34b   : > { %v1012_v51 = vmul.f32 %v1492_v48, %v1001_v50 }
 0x34c PF: > { %v1022_v53 = vld [vmem:[%s1656_s19] sm:$0xff]  ;;  %v1023_v54 = vld [vmem:[%s1656_s19 + $0x8] sm:$0xff]  ;;  %v1024_v55 = vld [vmem:[%s1656_s19 + $0x10] sm:$0xff]  ;;  %p1335_p6 = scmp.ne.s32.totalorder %s1537_s23, 3 }
 0x34d   : > { %1414 = vmatprep.mubr.msk.f32.mxu0 %vm822_vm2, %v1012_v51  ;;  %v1427_v56 = vpack.c.bf16 %v1023_v54, %v1022_v53  ;;  %v1025_v57 = vld [vmem:[%s1656_s19 + $0x18] sm:$0xff]  ;;  %v1026_v59 = vld [vmem:[%s1656_s19 + $0x20] sm:$0xff]  ;;  %v1027_v60 = vld [vmem:[%s1656_s19 + $0x28] sm:$0xff] }
 0x34e   : > { %v1433_v58 = vpack.c.bf16 %v1025_v57, %v1024_v55  ;;  %v1439_v61 = vpack.c.bf16 %v1027_v60, %v1026_v59  ;;  %v1028_v62 = vld [vmem:[%s1656_s19 + $0x30] sm:$0xff]  ;;  %v1029_v63 = vld [vmem:[%s1656_s19 + $0x38] sm:$0xff]  ;;  %v1021_v1 = vld [vmem:[#allocation2 + $0x8] sm:$0xff] }
 0x34f   : > { %1429 = vmatprep.subr.msk.bf16.mxu0 %vm1701_vm3, %v1427_v56  ;;  %v1445_v0 = vpack.c.bf16 %v1029_v63, %v1028_v62  ;;  %v1020_v2 = vld [vmem:[#allocation2] sm:$0xff] }
 0x350   : > { %1432 = vmatpush3.bf16.xpose.msk.msra.mxu0 %vm1701_vm3, %v1427_v56  ;;  %v1336_v8 = vld [vmem:[%s1805_s11] ss:$0 sm:$0xff] (!%p1335_p6) }
 0x351   : > { %1435 = vmatprep.subr.msk.bf16.mxu0 %vm1701_vm3, %v1433_v58 }
 0x358   : > { %1438 = vmatpush3.bf16.xpose.msk.msra.mxu0 %vm1701_vm3, %v1433_v58 }
 0x359   : > { %1441 = vmatprep.subr.msk.bf16.mxu0 %vm1701_vm3, %v1439_v61 }
 0x360   : > { %1444 = vmatpush3.bf16.xpose.msk.msra.mxu0 %vm1701_vm3, %v1439_v61 }
 0x361   : > { %1447 = vmatprep.subr.msk.bf16.mxu0 %vm1701_vm3, %v1445_v0 }
 0x368   : > { %1450 = vmatpush3.bf16.xpose.msk.msra.mxu0 %vm1701_vm3, %v1445_v0 }
 0x36f   : > { %1415 = vmatmul.mubr.msk.f32.vlgmr.msra.gmra.mrb[0].mxu0 %vm822_vm2, %v1013_v49 }
 0x440   : > { %1142 = sbr.rel (%p1335_p6) target bundleno = 1105 (0x451), region = 76 }
 0x442   : > { %v1416_v3 = vpop.f32.mrb[0].mxu0 }
 0x443   : > { %v1136_v4 = vadd.f32 %v1416_v3, %v1021_v1  ;;  %v1126_v5 = vpop.f32.mrb[1].mxu0 }
 0x444   : > { %v1135_v6 = vadd.f32 %v1126_v5, %v1020_v2 }
 0x445   : > { %1138 = vst.msk [vmem:[#allocation2 + $0x8] sm:$0xff] %vm643_vm1, %v1136_v4 }
 0x446   : > { %1137 = vst.msk [vmem:[#allocation2] sm:$0xff] %vm643_vm1, %v1135_v6 }
 0x44c   : > { %v1144_v9 = vld [vmem:[#allocation2 + $0x8] sm:$0xff] }
 0x44d   : > { %v1143_v7 = vld [vmem:[#allocation2] sm:$0xff]  ;;  %v1153_v11 = vadd.f32 %v1336_v8, %v1144_v9 }
 0x44e   : > { %v1152_v10 = vadd.f32 %v1336_v8, %v1143_v7 }
 0x44f   : > { %1155 = vst.msk [vmem:[#allocation4 + $0x8] sm:$0xff] %vm643_vm1, %v1153_v11 }
 0x450   : > { %1154 = vst.msk [vmem:[#allocation4] sm:$0xff] %vm643_vm1, %v1152_v10 }
 0x451 PF: > { %p1759_p7 = scmp.eq.s32.totalorder %s1296_s0, 3  ;;  %s1548_s23 = smov [#allocation4]  }
 0x452   : > { %s1165_s28 = sshll.u32 %s1548_s23, 4  ;;  %s1166_s28 = int_to_ptr.vmem [resolvable:$true] %s1165_s28 }
 0x453   : > { %s1493_s14 = scalar_lea.vmem %s1166_s28, 256  ;;  %p1500_p11 = scmp.lt.s32.totalorder %s1166_s28, %s1166_s28 }
 0x454   : > { %p1494_p8 = scmp.ne.s32.totalorder %s1166_s28, %s1493_s14  ;;  %p1501_p12 = scmp.lt.s32.totalorder %s1493_s14, %s1493_s14 }
 0x456   : > { %p1495_p9 = pnand %p1494_p8, %p1759_p7  ;;  %p1502_p13 = por %p1501_p12, %p1500_p11 }
 0x458   : > { %p1496_p10 = pneg %p1495_p9 }
 0x45a   : > { %p1503_p0 = pnand %p1502_p13, %p1496_p10 }
 0x45c   : > { %1506 = shalt.err (!%p1503_p0)
}
 0x45d   : > { %s1507_s0 = scalar_lea.hbm %s1806_s12, 256 }
 0x45e   : > { %p1508_p1 = scmp.ne.s32.totalorder %s1806_s12, %s1507_s0  ;;  %p1513_p4 = scmp.lt.u32.totalorder %s1507_s0, %s1806_s12 }
 0x460   : > { %p1509_p2 = pnand %p1508_p1, %p1759_p7 }
 0x462   : > { %p1510_p3 = pneg %p1509_p2 }
 0x464   : > { %p1515_p5 = pnand %p1513_p4, %p1510_p3 }
 0x466   : > { %1518 = shalt.err (!%p1515_p5)
}
 0x467   : > { %s1549_s20 = smov 128   ;;  %s1550_s21 = smov 8  }
 0x468   : > { %1452 = dma.vmem_to_hbm [thread:$0]  (%p1759_p7), %s1166_s28, 256, %s1806_s12, [#allocation5], %s1549_s20, %s1549_s20, %s1550_s21  }
 0x469   : > { %1532 = dma.done.wait (%p1759_p7), [#allocation5], 256  }
 0x46a   : > { %1534 = vsyncadd (%p1759_p7), [#allocation5], 4294967040 }
 0x46b PF: > { %s24_s25 = sadd.s32 1, %s1545_s25   ;;  %s1810_s23 = smov %s1541_s24 }
 0x46c   : > { %p21_p6 = scmp.ge.s32.totalorder %s24_s25, 6   ;;  %s1811_s24 = smov %s1813_s26 }
 0x46e   :  { %23 = sbr.rel (!%p21_p6) target bundleno = 4 (0x4), region = 125 }
 0x475   :  { %1181 = vsyncpa [#allocation5], 1 }
 0x476   :  { %1183 = vsyncpa [#allocation5 + $0x1], 1 }

</bundles_post_ra>
